<compile_context>
chip_gen: v7x
topology: tpu7x:2x2x1
jax: 0.10.0
libtpu: 0.0.40
codegen_flags: <defaults>
</compile_context>

<pallas_src>
import jax
import jax.numpy as jnp
from jax.experimental import pallas as pl
from jax.experimental.pallas import tpu as pltpu

IGNORE_INDEX = -100
_NEG_BIG = -1.0e30  # finite stand-in for -inf (safe for exp / max math)


# --------------------------------------------------------------------------
# helpers
# --------------------------------------------------------------------------
def _cdiv(a, b):
    return (a + b - 1) // b


def _round_up(x, m):
    return ((x + m - 1) // m) * m


def _sublane_multiple(dtype):
    # 8 rows/vreg for 4-byte, 16 for 2-byte, 32 for 1-byte dtypes.
    return max(8, 32 // jnp.dtype(dtype).itemsize)


def _vmem_capacity_bytes():
    try:
        info = pltpu.get_tpu_info()
        cap = getattr(info, "vmem_capacity_bytes", None)
        if cap:
            return int(cap)
    except Exception:
        pass
    return 64 << 20  # conservative fallback (v7x per-TensorCore VMEM)


# --------------------------------------------------------------------------
# kernel variant 1: whole vocab in one tile (no online softmax, no scratch)
# --------------------------------------------------------------------------
def _make_single_tile_kernel(mask_student_inf):
    def kernel(s_ref, t_ref, x_ref):
        s_nat = s_ref[...]                       # native dtype (bf16/f32)
        t = t_ref[...].astype(jnp.float32)
        s = s_nat.astype(jnp.float32)

        # teacher softmax weights (z_t is the normalizer)
        m_t = jnp.max(t, axis=-1, keepdims=True)
        e_t = jnp.exp(t - m_t)
        z_t = jnp.sum(e_t, axis=-1, keepdims=True)

        if mask_student_inf:
            # clamp -inf so masked 0 * s stays finite; zero masked products.
            s_eff = jnp.maximum(s, _NEG_BIG)
            pm = jnp.where(jnp.isinf(s_nat), 0.0, e_t)
            b = jnp.sum(pm, axis=-1, keepdims=True)
        else:
            s_eff = s
            pm = e_t
            b = None

        # student log-sum-exp
        m_s = jnp.max(s_eff, axis=-1, keepdims=True)
        z_s = jnp.sum(jnp.exp(s_eff - m_s), axis=-1, keepdims=True)
        lse_s = m_s + jnp.log(z_s)

        a = jnp.sum(pm * s_eff, axis=-1, keepdims=True)
        if mask_student_inf:
            # x = sum_j softmax(t)_j * (s_j - lse_s) * mask_j = (A - lse*B)/z_t
            x_ref[...] = (a - lse_s * b) / z_t
        else:
            x_ref[...] = a / z_t - lse_s

    return kernel


# --------------------------------------------------------------------------
# kernel variant 2: vocab-tiled online softmax (flash-style)
# --------------------------------------------------------------------------
def _make_tiled_kernel(V, TV, nv, need_col_mask, mask_student_inf):
    def body(s_ref, t_ref, x_ref, mt_ref, zt_ref, a_ref, b_ref, ms_ref, zs_ref):
        v = pl.program_id(1)

        @pl.when(v == 0)
        def _init():
            mt_ref[...] = jnp.full(mt_ref.shape, _NEG_BIG, jnp.float32)
            ms_ref[...] = jnp.full(ms_ref.shape, _NEG_BIG, jnp.float32)
            zt_ref[...] = jnp.zeros(zt_ref.shape, jnp.float32)
            zs_ref[...] = jnp.zeros(zs_ref.shape, jnp.float32)
            a_ref[...] = jnp.zeros(a_ref.shape, jnp.float32)
            if b_ref is not None:
                b_ref[...] = jnp.zeros(b_ref.shape, jnp.float32)

        def step(apply_col_mask):
            s_nat = s_ref[...]                   # native dtype (bf16/f32)
            t = t_ref[...].astype(jnp.float32)
            s = s_nat.astype(jnp.float32)

            if apply_col_mask:
                col = jax.lax.broadcasted_iota(jnp.int32, s.shape, 1)
                col_valid = (col + v * TV) < V
                # padded columns: force very negative so exp underflows to 0.
                t_eff = jnp.where(col_valid, t, _NEG_BIG)
                if mask_student_inf:
                    s_eff = jnp.where(col_valid, jnp.maximum(s, _NEG_BIG),
                                      _NEG_BIG)
                    pm_bad = jnp.logical_or(jnp.isinf(s_nat),
                                            jnp.logical_not(col_valid))
                else:
                    s_eff = jnp.where(col_valid, s, _NEG_BIG)
            else:
                # fast path: no column mask, teacher logits need no clamp
                # (-inf in t only drives exp() to 0).
                t_eff = t
                if mask_student_inf:
                    s_eff = jnp.maximum(s, _NEG_BIG)   # keep 0 * s finite
                    pm_bad = jnp.isinf(s_nat)          # native-dtype predicate
                else:
                    s_eff = s

            # ---- teacher: online softmax-weighted sums ----
            mt_old = mt_ref[...]
            mt_new = jnp.maximum(mt_old, jnp.max(t_eff, axis=-1, keepdims=True))
            alpha = jnp.exp(mt_old - mt_new)
            e_t = jnp.exp(t_eff - mt_new)
            zt_ref[...] = alpha * zt_ref[...] + jnp.sum(e_t, axis=-1,
                                                        keepdims=True)
            if mask_student_inf:
                pm = jnp.where(pm_bad, 0.0, e_t)
                b_ref[...] = alpha * b_ref[...] + jnp.sum(pm, axis=-1,
                                                          keepdims=True)
            else:
                pm = e_t
            a_ref[...] = alpha * a_ref[...] + jnp.sum(pm * s_eff, axis=-1,
                                                      keepdims=True)
            mt_ref[...] = mt_new

            # ---- student: online log-sum-exp ----
            ms_old = ms_ref[...]
            ms_new = jnp.maximum(ms_old, jnp.max(s_eff, axis=-1, keepdims=True))
            beta = jnp.exp(ms_old - ms_new)
            zs_ref[...] = beta * zs_ref[...] + jnp.sum(
                jnp.exp(s_eff - ms_new), axis=-1, keepdims=True)
            ms_ref[...] = ms_new

        if need_col_mask:
            # pay the iota/compare/select cost only on the last vocab tile
            @pl.when(v < nv - 1)
            def _fast():
                step(False)

            @pl.when(v == nv - 1)
            def _masked():
                step(True)
        else:
            step(False)

        @pl.when(v == nv - 1)
        def _finalize():
            lse_s = ms_ref[...] + jnp.log(zs_ref[...])
            if mask_student_inf:
                x_ref[...] = (a_ref[...] - lse_s * b_ref[...]) / zt_ref[...]
            else:
                x_ref[...] = a_ref[...] / zt_ref[...] - lse_s

    if mask_student_inf:
        def kernel(s_ref, t_ref, x_ref, mt, zt, a, b, ms, zs):
            body(s_ref, t_ref, x_ref, mt, zt, a, b, ms, zs)
    else:
        def kernel(s_ref, t_ref, x_ref, mt, zt, a, ms, zs):
            body(s_ref, t_ref, x_ref, mt, zt, a, None, ms, zs)
    return kernel


# --------------------------------------------------------------------------
# wrappers
# --------------------------------------------------------------------------
def kd_per_token_x(logits2d, teacher2d, *, block_m=None, block_v=None,
                   mask_student_inf=True):
    """x[i] = sum_j softmax(teacher)[i,j] * log_softmax(student)[i,j]
    (student -inf columns zeroed when mask_student_inf).  Shape (N,), f32."""
    N, V = logits2d.shape
    in_itemsize = logits2d.dtype.itemsize + teacher2d.dtype.itemsize
    sub = max(_sublane_multiple(logits2d.dtype),
              _sublane_multiple(teacher2d.dtype))
    V_pad = _round_up(V, 128)

    # per-generation VMEM budget (128 MiB v5e/v6e, 64 MiB per-TC v7x)
    cap = _vmem_capacity_bytes()
    budget = min(int(0.70 * cap), cap - (12 << 20))

    # token tile: dtype sublane multiple; keep >=2 token blocks when possible
    # so both v7x TensorCores get work ("parallel" token axis).
    tm = 256 if block_m is None else block_m
    tm = _round_up(min(tm, _round_up(N, sub)), sub)
    if N > sub:
        tm = min(tm, _round_up(_cdiv(N, 2), sub))
    tm = max(tm, sub)

    # ---------- single-vocab-tile fast path ----------
    single_bytes = 2 * tm * V_pad * in_itemsize   # double-buffered inputs
    want_single = (block_v is None) or (block_v >= V)
    if want_single and single_bytes <= budget:
        vmem_limit = int(min(cap - (2 << 20), single_bytes + (16 << 20)))
        x = pl.pallas_call(
            _make_single_tile_kernel(mask_student_inf),
            out_shape=jax.ShapeDtypeStruct((N, 1), jnp.float32),
            grid_spec=pltpu.PrefetchScalarGridSpec(
                num_scalar_prefetch=0,
                grid=(_cdiv(N, tm),),
                in_specs=[pl.BlockSpec((tm, V), lambda i: (i, 0)),
                          pl.BlockSpec((tm, V), lambda i: (i, 0))],
                out_specs=pl.BlockSpec((tm, 1), lambda i: (i, 0)),
            ),
            compiler_params=pltpu.CompilerParams(
                dimension_semantics=("parallel",),
                vmem_limit_bytes=vmem_limit),
        )(logits2d, teacher2d)
        return x[:, 0]

    # ---------- vocab-tiled online-softmax path ----------
    if block_v is not None:
        tv = _round_up(min(block_v, V_pad), 128)
    else:
        tv_fit = max(128, (budget - (4 << 20)) // (2 * tm * in_itemsize))
        tv = max(128, min((tv_fit // 128) * 128, 8192, V_pad))
    nv = _cdiv(V, tv)
    need_col_mask = (V % tv) != 0

    num_scratch = 6 if mask_student_inf else 5
    vmem_need = (2 * tm * tv * in_itemsize            # double-buffered inputs
                 + (num_scratch + 2) * tm * 128 * 4)  # scratch + out (lane-padded)
    vmem_limit = int(min(cap - (2 << 20), vmem_need + (8 << 20)))

    kernel = _make_tiled_kernel(V, tv, nv, need_col_mask, mask_student_inf)
    x = pl.pallas_call(
        kernel,
        out_shape=jax.ShapeDtypeStruct((N, 1), jnp.float32),
        grid_spec=pltpu.PrefetchScalarGridSpec(
            num_scalar_prefetch=0,
            grid=(_cdiv(N, tm), nv),
            in_specs=[pl.BlockSpec((tm, tv), lambda i, v: (i, v)),   # student
                      pl.BlockSpec((tm, tv), lambda i, v: (i, v))],  # teacher
            out_specs=pl.BlockSpec((tm, 1), lambda i, v: (i, 0)),
            scratch_shapes=[pltpu.VMEM((tm, 1), jnp.float32)] * num_scratch,
        ),
        compiler_params=pltpu.CompilerParams(
            dimension_semantics=("parallel", "arbitrary"),
            vmem_limit_bytes=vmem_limit),
    )(logits2d, teacher2d)
    return x[:, 0]


def kd_loss(logits, teacher_logits, label, *, block_m=None, block_v=None,
            mask_student_inf=True):
    """logits/teacher_logits: (B, T, V) any float dtype; label: (B, T) int.
    Returns scalar float32 distillation loss."""
    V = logits.shape[-1]
    N = 1
    for d in logits.shape[:-1]:
        N *= d
    x = kd_per_token_x(logits.reshape(N, V), teacher_logits.reshape(N, V),
                       block_m=block_m, block_v=block_v,
                       mask_student_inf=mask_student_inf)
    mask = (label.reshape(-1) != IGNORE_INDEX).astype(jnp.float32)
    # Note: if every label is IGNORE_INDEX this divides by zero -> NaN,
    # matching PyTorch's behavior.
    return -jnp.sum(x * mask) / jnp.sum(mask)


def _reference_kd_loss(logits, teacher_logits, label):
    """Pure-JAX reference with identical semantics (for validation)."""
    s = logits.astype(jnp.float32)
    t = teacher_logits.astype(jnp.float32)
    tp = jax.nn.softmax(t, axis=-1)
    lp = jax.nn.log_softmax(s, axis=-1)
    prod = jnp.where(jnp.isinf(s), 0.0, tp * lp)
    x = jnp.sum(prod, axis=-1).reshape(-1)
    mask = (label.reshape(-1) != IGNORE_INDEX).astype(jnp.float32)
    return -jnp.sum(x * mask) / jnp.sum(mask)


# --------------------------------------------------------------------------
# self-test
# --------------------------------------------------------------------------
if __name__ == "__main__":
    key = jax.random.PRNGKey(0)
    k1, k2, k3, k4, k5 = jax.random.split(key, 5)

    # ---- test A: single-vocab-tile path, f32, -inf student entries ----
    B, T, V = 2, 8, 128
    logits = jax.random.normal(k1, (B, T, V), dtype=jnp.float32)
    teacher = jax.random.normal(k2, (B, T, V), dtype=jnp.float32)
    label = jax.random.randint(k3, (B, T), 0, V, dtype=jnp.int32)
    label = label.at[:, :2].set(IGNORE_INDEX)
    logits = logits.at[0, 3, 7].set(-jnp.inf)      # vocab-masked entries
    logits = logits.at[1, 5, 0].set(-jnp.inf)

    outA = jax.block_until_ready(kd_loss(logits, teacher, label))
    refA = jax.block_until_ready(_reference_kd_loss(logits, teacher, label))
    assert jnp.isfinite(outA), "loss is not finite"
    assert jnp.allclose(outA, refA, rtol=1e-5, atol=1e-5), (outA, refA)

    # ---- test B: single-tile path with native bf16 inputs ----
    outB = jax.block_until_ready(
        kd_loss(logits.astype(jnp.bfloat16), teacher.astype(jnp.bfloat16),
                label))
    refB = jax.block_until_ready(
        _reference_kd_loss(logits.astype(jnp.bfloat16),
                           teacher.astype(jnp.bfloat16), label))
    assert jnp.allclose(outB, refB, rtol=1e-4, atol=1e-4), (outB, refB)

    # ---- test C: vocab-tiled path, partial last vocab tile (col mask) ----
    B2, T2, V2 = 2, 9, 300
    logits2 = jax.random.normal(k4, (B2, T2, V2), dtype=jnp.float32) * 3.0
    teacher2 = jax.random.normal(k5, (B2, T2, V2), dtype=jnp.float32) * 3.0
    label2 = jax.random.randint(k3, (B2, T2), 0, V2, dtype=jnp.int32)
    label2 = label2.at[0, :3].set(IGNORE_INDEX)
    logits2 = logits2.at[1, 2, 17].set(-jnp.inf)

    outC = jax.block_until_ready(
        kd_loss(logits2, teacher2, label2, block_m=8, block_v=128))
    refC = jax.block_until_ready(_reference_kd_loss(logits2, teacher2, label2))
    assert jnp.allclose(outC, refC, rtol=5e-5, atol=5e-5), (outC, refC)

    # ---- test D: vocab-tiled path, no col mask, inf masking on ----
    B3, T3, V3 = 2, 8, 256
    logits3 = jax.random.normal(k4, (B3, T3, V3), dtype=jnp.float32)
    teacher3 = jax.random.normal(k5, (B3, T3, V3), dtype=jnp.float32)
    label3 = jax.random.randint(k3, (B3, T3), 0, V3, dtype=jnp.int32)
    label3 = label3.at[1, :2].set(IGNORE_INDEX)
    logits3 = logits3.at[0, 1, 5].set(-jnp.inf)

    outD = jax.block_until_ready(kd_loss(logits3, teacher3, label3,
                                         block_v=128))
    refD = jax.block_until_ready(_reference_kd_loss(logits3, teacher3, label3))
    assert jnp.allclose(outD, refD, rtol=2e-5, atol=2e-5), (outD, refD)

    # ---- test E: vocab-tiled path with mask_student_inf=False (no inf) ----
    B4, T4, V4 = 2, 8, 384
    logits4 = jax.random.normal(k1, (B4, T4, V4), dtype=jnp.float32)
    teacher4 = jax.random.normal(k2, (B4, T4, V4), dtype=jnp.float32)
    label4 = jax.random.randint(k3, (B4, T4), 0, V4, dtype=jnp.int32)
    label4 = label4.at[0, :1].set(IGNORE_INDEX)

    outE = jax.block_until_ready(
        kd_loss(logits4, teacher4, label4, block_v=128,
                mask_student_inf=False))
    refE = jax.block_until_ready(_reference_kd_loss(logits4, teacher4, label4))
    assert jnp.allclose(outE, refE, rtol=2e-5, atol=2e-5), (outE, refE)

    # ---- test F: single-tile path with mask_student_inf=False ----
    clean_logits = jax.random.normal(k1, (B, T, V), dtype=jnp.float32)
    outF = jax.block_until_ready(
        kd_loss(clean_logits, teacher, label, mask_student_inf=False))
    refF = jax.block_until_ready(
        _reference_kd_loss(clean_logits, teacher, label))
    assert jnp.allclose(outF, refF, rtol=1e-5, atol=1e-5), (outF, refF)

    print("KERNEL_OK")
</pallas_src>

<mosaic_0001>
module attributes {stable_mosaic.version = 11 : i64} {
  func.func @kernel(%arg0: i32, %arg1: memref<8x128xf32, #tpu.memory_space<vmem>>, %arg2: memref<8x128xf32, #tpu.memory_space<vmem>>, %arg3: memref<8x1xf32, #tpu.memory_space<vmem>>) attributes {dimension_semantics = [#tpu.dimension_semantics<parallel>], iteration_bounds = array<i64: 2>, scalar_prefetch = 0 : i64, scratch_operands = 0 : i64, tpu.core_type = #tpu.core_type<tc>, window_params = [{transform_indices = @transform_0, window_bounds = array<i64: 8, 128>}, {transform_indices = @transform_1, window_bounds = array<i64: 8, 128>}, {transform_indices = @transform_2, window_bounds = array<i64: 8, 1>}]} {
    %c0 = arith.constant 0 : index
    %c0_0 = arith.constant 0 : index
    %0 = vector.load %arg1[%c0, %c0_0] : memref<8x128xf32, #tpu.memory_space<vmem>>, vector<8x128xf32>
    %c0_1 = arith.constant 0 : index
    %c0_2 = arith.constant 0 : index
    %1 = vector.load %arg2[%c0_1, %c0_2] : memref<8x128xf32, #tpu.memory_space<vmem>>, vector<8x128xf32>
    %cst = arith.constant dense<0xFF800000> : vector<8xf32>
    %2 = vector.multi_reduction <maximumf>, %1, %cst [1] : vector<8x128xf32> to vector<8xf32>
    %3 = vector.shape_cast %2 : vector<8xf32> to vector<8x1xf32>
    %4 = vector.broadcast %3 : vector<8x1xf32> to vector<8x128xf32>
    %5 = arith.subf %1, %4 : vector<8x128xf32>
    %6 = math.exp %5 : vector<8x128xf32>
    %cst_3 = arith.constant dense<0.000000e+00> : vector<8xf32>
    %7 = vector.multi_reduction <add>, %6, %cst_3 [1] : vector<8x128xf32> to vector<8xf32>
    %8 = vector.shape_cast %7 : vector<8xf32> to vector<8x1xf32>
    %cst_4 = arith.constant -1.000000e+30 : f32
    %9 = vector.broadcast %cst_4 : f32 to vector<8x128xf32>
    %10 = arith.maximumf %0, %9 : vector<8x128xf32>
    %11 = math.absf %0 : vector<8x128xf32>
    %cst_5 = arith.constant 0x7F800000 : f32
    %12 = vector.broadcast %cst_5 : f32 to vector<8x128xf32>
    %13 = arith.cmpf oeq, %11, %12 : vector<8x128xf32>
    %cst_6 = arith.constant 0.000000e+00 : f32
    %14 = vector.broadcast %cst_6 : f32 to vector<8x128xf32>
    %15 = arith.select %13, %14, %6 : vector<8x128xi1>, vector<8x128xf32>
    %cst_7 = arith.constant dense<0.000000e+00> : vector<8xf32>
    %16 = vector.multi_reduction <add>, %15, %cst_7 [1] : vector<8x128xf32> to vector<8xf32>
    %17 = vector.shape_cast %16 : vector<8xf32> to vector<8x1xf32>
    %cst_8 = arith.constant dense<0xFF800000> : vector<8xf32>
    %18 = vector.multi_reduction <maximumf>, %10, %cst_8 [1] : vector<8x128xf32> to vector<8xf32>
    %19 = vector.shape_cast %18 : vector<8xf32> to vector<8x1xf32>
    %20 = vector.broadcast %19 : vector<8x1xf32> to vector<8x128xf32>
    %21 = arith.subf %10, %20 : vector<8x128xf32>
    %22 = math.exp %21 : vector<8x128xf32>
    %cst_9 = arith.constant dense<0.000000e+00> : vector<8xf32>
    %23 = vector.multi_reduction <add>, %22, %cst_9 [1] : vector<8x128xf32> to vector<8xf32>
    %24 = vector.shape_cast %23 : vector<8xf32> to vector<8x1xf32>
    %25 = math.log %24 : vector<8x1xf32>
    %26 = arith.addf %19, %25 : vector<8x1xf32>
    %27 = arith.mulf %15, %10 : vector<8x128xf32>
    %cst_10 = arith.constant dense<0.000000e+00> : vector<8xf32>
    %28 = vector.multi_reduction <add>, %27, %cst_10 [1] : vector<8x128xf32> to vector<8xf32>
    %29 = vector.shape_cast %28 : vector<8xf32> to vector<8x1xf32>
    %30 = arith.mulf %26, %17 : vector<8x1xf32>
    %31 = arith.subf %29, %30 : vector<8x1xf32>
    %32 = arith.divf %31, %8 : vector<8x1xf32>
    %c0_11 = arith.constant 0 : index
    %c0_12 = arith.constant 0 : index
    %33 = vector.load %arg3[%c0_11, %c0_12] : memref<8x1xf32, #tpu.memory_space<vmem>>, vector<8x1xf32>
    tpu.vector_store %arg3[%c0_11, %c0_12], %32 {strides = array<i32>} : memref<8x1xf32, #tpu.memory_space<vmem>>, vector<8x1xf32>,
    return
  }
  func.func @transform_0(%arg0: i32) -> (i32, i32) {
    %c0_i32 = arith.constant 0 : i32
    %c0_i32_0 = arith.constant 0 : i32
    return %arg0, %c0_i32 : i32, i32
  }
  func.func @transform_1(%arg0: i32) -> (i32, i32) {
    %c0_i32 = arith.constant 0 : i32
    %c0_i32_0 = arith.constant 0 : i32
    return %arg0, %c0_i32 : i32, i32
  }
  func.func @transform_2(%arg0: i32) -> (i32, i32) {
    %c0_i32 = arith.constant 0 : i32
    %c0_i32_0 = arith.constant 0 : i32
    return %arg0, %c0_i32 : i32, i32
  }
}

</mosaic_0001>

<bundles_post_ra>
// kernel: tpu_custom_call.1
= control target key start
LH: loop header
LB: loop body
LE: loop exit
PB: predicated region body
PF: predicated region fallthrough
CT: control target
= control target key end

     0   :  { %7 = vsyncpa [#allocation3], 0  ;;  %s654_s0 = inlined_call_operand.hbm [shape: f32[16,128], index: 0, kind: input, shape index: {}]   ;;  %s655_s1 = inlined_call_operand.hbm [shape: f32[16,128], index: 1, kind: input, shape index: {}]   ;;  %s656_s2 = inlined_call_operand.vmem [shape: f32[16,1], index: 2, kind: output, shape index: {}]  }
   0x1   :  { %9 = vsyncpa [#allocation3 + $0x1], 0 }
   0x2   :  { %10 = vsyncpa [#allocation5], 0 }
   0x3   :  { %12 = vsyncpa [#allocation5 + $0x1], 0  ;;  %s500_s9 = smov 0   ;;  %s502_s10 = smov 0  }
   0x4   :  { %s504_s11 = smov 0   ;;  %s506_s12 = smov 0  }
   0x5 LB: > { %s519_s13 = sadd.s32 4294967295, %s481_s12   ;;  %s522_s14 = sadd.s32 1, %s481_s12   ;;  %s481_s12 = sphi %s506_s12, %s668_s12   ;;  %s477_s11 = sphi %s504_s11, %s667_s11   ;;  %s473_s10 = sphi %s502_s10, %s666_s10   ;;  %s469_s9 = sphi %s500_s9, %s665_s9  }
   0x6   : > { %s22_s15 = ssub.s32 %s481_s12, %s522_s14  ;;  %s25_s16 = sadd.s32 1, %s477_s11 }
   0x7   : > { %p23_p0 = scmp.eq.s32.totalorder %s22_s15, 0  ;;  %p32_p1 = scmp.ne.s32.totalorder %s477_s11, %s473_s10 }
   0x8   : > { %p33_p2 = scmp.eq.s32.totalorder %s481_s12, 0  ;;  %p38_p3 = scmp.ne.s32.totalorder %s473_s10, %s469_s9 }
   0x9   : > { %s532_s17 = scalar_select %p23_p0, %s477_s11, %s25_s16  }
   0xa   : > { %p34_p4 = por %p33_p2, %p32_p1  ;;  %p39_p5 = scmp.eq.s32.totalorder %s519_s13, 0 }
   0xb   : > { %p342_p6 = scmp.lt.s32.totalorder %s481_s12, 2  ;;  %s541_s19 = sand.u32 1, %s477_s11  }
   0xc   : > { %p536_p7 = por %p39_p5, %p38_p3  ;;  %s321_s20 = sshll.u32 %s541_s19, 3 }
   0xd   : > { %s322_s21 = sshll.u32 %s481_s12, 7  ;;  %s118_s25 = scalar_lea.vmem [#allocation2], %s321_s20 }
   0xe   : > { %s658_s18 = scalar_select %p536_p7, 1, 0 }
   0xf   : > { %s550_s24 = scalar_lea.hbm %s654_s0, %s322_s21  ;;  %s125_s26 = sshll.u32 %s118_s25, 4  ;;  %s554_s26 = int_to_ptr.vmem [resolvable:$true] %s125_s26 }
  0x10   : > { %p556_p8 = pnand %p342_p6, %p34_p4  ;;  %s115_s28 = scalar_lea.sflag [#allocation3], %s541_s19 }
  0x11   : > { %s383_s29 = scalar_lea.hbm %s550_s24, 128  ;;  %s388_s4 = scalar_lea.hbm %s654_s0, 256 }
  0x12   : > { %p384_p11 = scmp.ne.s32.totalorder %s550_s24, %s383_s29  ;;  %p385_p12 = pneg %p556_p8 }
  0x13   : > { %p389_p1 = scmp.lt.u32.totalorder %s550_s24, %s654_s0  ;;  %p390_p2 = scmp.lt.u32.totalorder %s388_s4, %s383_s29 }
  0x14   : > { %p386_p13 = pnand %p385_p12, %p384_p11  ;;  %p392_p4 = scmp.lt.u32.totalorder %s383_s29, %s550_s24 }
  0x15   : > { %p391_p3 = por %p390_p2, %p389_p1 }
  0x16   : > { %p387_p0 = pneg %p386_p13 }
  0x17   : > { %p393_p5 = por %p392_p4, %p391_p3 }
  0x19   : > { %p394_p6 = pnand %p393_p5, %p387_p0 }
  0x1b   : > { %397 = shalt.err (!%p394_p6)
}
  0x1c   : > { %s398_s7 = scalar_lea.vmem %s554_s26, 128  ;;  %s483_s8 = smov [#allocation2]  }
  0x1d   : > { %p399_p11 = scmp.ne.s32.totalorder %s554_s26, %s398_s7  ;;  %s403_s9 = sshll.u32 %s483_s8, 4  ;;  %s404_s9 = int_to_ptr.vmem [resolvable:$false] %s403_s9 }
  0x1e   : > { %s405_s15 = scalar_lea.vmem %s404_s9, 256  ;;  %p406_p10 = scmp.lt.s32.totalorder %s554_s26, %s404_s9 }
  0x1f   : > { %p401_p13 = pnand %p399_p11, %p385_p12  ;;  %p407_p1 = scmp.lt.s32.totalorder %s405_s15, %s398_s7 }
  0x21   : > { %p402_p9 = pneg %p401_p13  ;;  %p408_p2 = por %p407_p1, %p406_p10 }
  0x23   : > { %p409_p3 = pnand %p408_p2, %p402_p9 }
  0x25   : > { %412 = shalt.err (!%p409_p3)
}
  0x26   : > { %338 = dma.hbm_to_vmem [thread:$0]  (!%p556_p8), %s550_s24, 128, %s554_s26, %s115_s28  }
  0x27   : > { %p660_p0 = scmp.lt.s32.totalorder %s481_s12, 3  ;;  %p661_p4 = scmp.ge.s32.totalorder %s481_s12, 1 }
  0x28   : > { %s601_s25 = scalar_lea.hbm %s655_s1, %s322_s21  ;;  %s136_s29 = scalar_lea.vmem [#allocation4], %s321_s20 }
  0x29   : > { %p592_p5 = pnand %p661_p4, %p660_p0  ;;  %s143_s30 = sshll.u32 %s136_s29, 4  ;;  %s144_s30 = int_to_ptr.vmem [resolvable:$true] %s143_s30 }
  0x2a   : > { %s133_s24 = scalar_lea.sflag [#allocation5], %s541_s19  ;;  %s413_s26 = scalar_lea.hbm %s601_s25, 128 }
  0x2b   : > { %s662_s16 = scalar_select %p592_p5, 1, 0 }
  0x2c   : > { %p414_p9 = scmp.ne.s32.totalorder %s601_s25, %s413_s26  ;;  %s418_s21 = scalar_lea.hbm %s655_s1, 256 }
  0x2d   : > { %p419_p11 = scmp.lt.u32.totalorder %s601_s25, %s655_s1  ;;  %p420_p13 = scmp.lt.u32.totalorder %s418_s21, %s413_s26 }
  0x2e   : > { %p416_p10 = pnand %p414_p9, %p385_p12  ;;  %p422_p2 = scmp.lt.u32.totalorder %s413_s26, %s601_s25 }
  0x2f   : > { %p421_p1 = por %p420_p13, %p419_p11 }
  0x30   : > { %p417_p6 = pneg %p416_p10 }
  0x31   : > { %p423_p3 = por %p422_p2, %p421_p1 }
  0x33   : > { %p424_p0 = pnand %p423_p3, %p417_p6 }
  0x35   : > { %427 = shalt.err (!%p424_p0)
}
  0x36   : > { %s428_s19 = scalar_lea.vmem %s144_s30, 128  ;;  %s484_s20 = smov [#allocation4]  }
  0x37   : > { %p429_p4 = scmp.ne.s32.totalorder %s144_s30, %s428_s19  ;;  %s433_s5 = sshll.u32 %s484_s20, 4  ;;  %s434_s5 = int_to_ptr.vmem [resolvable:$false] %s433_s5 }
  0x38   : > { %s435_s6 = scalar_lea.vmem %s434_s5, 256  ;;  %p436_p7 = scmp.lt.s32.totalorder %s144_s30, %s434_s5 }
  0x39   : > { %p431_p9 = pnand %p429_p4, %p385_p12  ;;  %p437_p5 = scmp.lt.s32.totalorder %s435_s6, %s428_s19 }
  0x3b   : > { %p432_p10 = pneg %p431_p9  ;;  %p438_p11 = por %p437_p5, %p436_p7 }
  0x3d   : > { %p439_p13 = pnand %p438_p11, %p432_p10 }
  0x3f   : > { %442 = shalt.err (!%p439_p13)
}
  0x40   : > { %341 = dma.hbm_to_vmem [thread:$0]  (!%p556_p8), %s601_s25, 128, %s144_s30, %s133_s24  }
  0x41   : > { %p663_p6 = scmp.ne.s32.totalorder %s662_s16, 0 }
  0x42   : > { %s154_s7 = sand.u32 (!%p663_p6), 1, %s473_s10   ;;  %p664_p12 = scmp.ne.s32.totalorder (!%p663_p6), %s658_s18, 0 }
  0x43   : > { %152 = sbr.rel (%p663_p6) target bundleno = 401 (0x191), region = 28  ;;  %s326_s8 = sshll.u32 (!%p663_p6), %s154_s7, 3 }
  0x44   : > { %s155_s9 = scalar_lea.sflag (!%p663_p6), [#allocation3], %s154_s7  ;;  %s158_s15 = scalar_lea.vmem (!%p663_p6), [#allocation2], %s326_s8 }
  0x4a   : > { %460 = dma.done.wait (%p664_p12), %s155_s9, 128  }
  0x4b   : > { %462 = vsyncadd (%p664_p12), %s155_s9, 4294967168  ;;  %s164_s22 = scalar_lea.sflag [#allocation5], %s154_s7  ;;  %s167_s23 = scalar_lea.vmem [#allocation4], %s326_s8 }
  0x4c   : > { %464 = dma.done.wait (%p664_p12), %s164_s22, 128  }
  0x4d   : > { %466 = vsyncadd (%p664_p12), %s164_s22, 4294967168  ;;  %v196_v0 = vld [vmem:[%s158_s15] sm:$0xff]  ;;  %v197_v2 = vld [vmem:[%s167_s23] sm:$0xff]  ;;  %p192_p7 = scmp.lt.s32.totalorder %s519_s13, 1  ;;  %vm228_vm1 = vcmask 7168  }
  0x4e   : > { %v205_v1 = vmax.f32 %v196_v0, -1e+30  ;;  %v206_v9 = vand.u32 2147483647, %v196_v0 }
  0x4f   : > { %s670_s13 = smov (!%p192_p7, %s519_s13), 1 }
  0x50   : > { %211 = vmax.xlane.f32.xlu0 %v205_v1  ;;  %vm207_vm0 = vcmp.eq.f32.partialorder %v206_v9, inf  ;;  %s328_s18 = sshll.u32 %s670_s13, 3 }
  0x51   : > { %s195_s25 = scalar_lea.vmem %s656_s2, %s328_s18 }
  0x54   : > { %198 = vmax.xlane.f32.xlu0 %v197_v2 }
  0xdd   : > { %v212_v3 = vpop.xlane.xlu0 %211 }
  0xde   : > { %v213_v4 = vsub.f32 %v205_v1, %v212_v3 }
  0xe0   : > { %v214_v5 = vmul.f32 1.442695, %v213_v4 }
  0xe1   : > { %v199_v6 = vpop.xlane.xlu0 %198 }
  0xe2   : > { %v200_v7 = vsub.f32 %v197_v2, %v199_v6  ;;  %375 = vpow2.f32 %v214_v5 }
  0xe4   : > { %v201_v8 = vmul.f32 1.442695, %v200_v7 }
  0xe6   : > { %377 = vpow2.f32 %v201_v8 }
  0xec   : > { %v376_v10 = vpop.eup %375 }
  0xed   : > { %216 = vadd.xlane.f32.xlu1 %v376_v10 }
  0xf0   : > { %v378_v11 = vpop.eup %377 }
  0xf1   : > { %203 = vadd.xlane.f32.xlu1 %v378_v11  ;;  %v208_v12 = vsel %vm207_vm0, 0.0, %v378_v11 }
  0xf2   : > { %209 = vadd.xlane.f32.xlu0 %v208_v12  ;;  %v221_v13 = vmul.f32 %v208_v12, %v205_v1 }
  0xf5   : > { %222 = vadd.xlane.f32.xlu1 %v221_v13 }
 0x17a   : > { %v217_v14 = vpop.xlane.xlu1 %216 }
 0x17b   : > { %379 = vlog2.f32 %v217_v14 }
 0x17e   : > { %v204_v15 = vpop.xlane.xlu1 %203 }
 0x17f   : > { %381 = vrcp.f32 %v204_v15  ;;  %v210_v19 = vpop.xlane.xlu0 %209 }
 0x182   : > { %v223_v22 = vpop.xlane.xlu1 %222 }
 0x185   : > { %v380_v16 = vpop.eup %379 }
 0x186   : > { %v219_v17 = vmul.f32 0.6931472, %v380_v16 }
 0x188   : > { %v220_v18 = vadd.f32 %v219_v17, %v212_v3 }
 0x189   : > { %v382_v21 = vpop.eup %381 }
 0x18a   : > { %v224_v20 = vmul.f32 %v220_v18, %v210_v19 }
 0x18c   : > { %v225_v23 = vsub.f32 %v223_v22, %v224_v20 }
 0x18e   : > { %v227_v24 = vmul.f32 %v382_v21, %v225_v23 }
 0x190   : > { %229 = vst.msk [vmem:[%s195_s25] sm:$0xff] %vm228_vm1, %v227_v24 }
 0x191 PF: > { %p15_p8 = scmp.ge.s32.totalorder %s522_s14, 4   ;;  %s665_s9 = smov %s473_s10 }
 0x192   : > { %s666_s10 = smov %s477_s11  ;;  %s667_s11 = smov %s532_s17 }
 0x193   : > { %s668_s12 = smov %s522_s14  ;;  %17 = sbr.rel (!%p15_p8) target bundleno = 5 (0x5), region = 81 }
 0x19a   :  { %249 = vsyncpa [#allocation3], 1 }
 0x19b   :  { %251 = vsyncpa [#allocation3 + $0x1], 1 }
 0x19c   :  { %252 = vsyncpa [#allocation5], 1 }
 0x19d   :  { %254 = vsyncpa [#allocation5 + $0x1], 1 }

</bundles_post_ra>
